<compile_context>
chip_gen: v7x
topology: tpu7x:2x2x1
jax: 0.10.0
libtpu: 0.0.40
codegen_flags: <defaults>
</compile_context>

<pallas_src>
import jax
import jax.numpy as jnp
from jax import lax
from jax.experimental import pallas as pl
from jax.experimental.pallas import tpu as pltpu


# ---------------------------------------------------------------------------
# Kernel
# ---------------------------------------------------------------------------
def spatial_attention_kernel(x_ref, k_ref, o_ref):
    # x_ref: (B_tile, C, HW) f32   one batch tile, spatial (H*W) on the lane axis
    # k_ref: (2*HW, HW)     bf16   stacked [K_avg*(1/C); K_max] conv-as-matmul operand
    # o_ref: (B_tile, C, HW) f32
    x = x_ref[...]                                              # (Bt, C, HW)

    # Channel-wise statistics (sublane reductions on the XLU).
    # 1/C is folded into the avg rows of k_ref, so the raw sum is enough.
    s = jnp.sum(x, axis=1)                                      # (Bt, HW)
    mx = jnp.max(x, axis=1)                                     # (Bt, HW)

    # Single fused MXU matmul for the whole batch tile: (Bt, 2*HW) @ (2*HW, HW).
    lhs = jnp.concatenate([s, mx], axis=-1).astype(k_ref.dtype)  # (Bt, 2*HW) bf16
    conv = jnp.dot(lhs, k_ref[...],
                   preferred_element_type=jnp.float32)          # (Bt, HW) f32

    att = jax.nn.sigmoid(conv)                                  # EUP, f32

    # Broadcast the attention map over the channel (sublane) axis on the VPU.
    o_ref[...] = (x * att[:, None, :]).astype(o_ref.dtype)      # (Bt, C, HW)


# ---------------------------------------------------------------------------
# Static conv-weight folding (done once; hoisted out of the forward path)
# ---------------------------------------------------------------------------
def conv_to_matrix(wk, H, W):
    """Fold one (KH, KW) conv tap-set (stride 1, SAME padding, cross-correlation
    like PyTorch Conv2d) into a dense (H*W, H*W) matrix M such that
    flat_in @ M == conv2d(in, wk) flattened with index h*W + w."""
    KH, KW = wk.shape
    ph, pw = KH // 2, KW // 2
    hi = jnp.arange(H)[:, None, None, None]      # input row
    wi = jnp.arange(W)[None, :, None, None]      # input col
    ho = jnp.arange(H)[None, None, :, None]      # output row
    wo = jnp.arange(W)[None, None, None, :]      # output col
    kh = hi - ho + ph
    kw = wi - wo + pw
    valid = (kh >= 0) & (kh < KH) & (kw >= 0) & (kw < KW)
    vals = wk[jnp.clip(kh, 0, KH - 1), jnp.clip(kw, 0, KW - 1)]
    vals = jnp.where(valid, vals, 0.0)
    return vals.reshape(H * W, H * W)            # [h_in*W+w_in, h_out*W+w_out]


def fold_conv_weights(conv_weight, H, W, C, dtype=jnp.bfloat16):
    """Build the stacked (2*HW, HW) matmul operand from the static Conv2d(2,1,k)
    weights (PyTorch OIHW layout). 1/C (channel mean) is folded into the avg rows."""
    w = conv_weight.astype(jnp.float32)
    k_avg = conv_to_matrix(w[0, 0], H, W) * jnp.float32(1.0 / C)
    k_max = conv_to_matrix(w[0, 1], H, W)
    return jnp.concatenate([k_avg, k_max], axis=0).astype(dtype)   # (2*HW, HW)


# ---------------------------------------------------------------------------
# Wrapper
# ---------------------------------------------------------------------------
def _choose_batch_tile(B, C, HW, vmem_budget_bytes=8 * 1024 * 1024):
    """Largest divisor of B whose per-step x+out VMEM (f32, double-buffered)
    stays under a modest budget. Fewer, fatter grid steps amortize the ~0.35us
    per-step overhead and give the conv matmul an M > 1 LHS."""
    bytes_per_b = C * HW * 4 * 2 * 2      # in + out, x2 for double buffering
    cap = max(1, vmem_budget_bytes // bytes_per_b)
    tile = 1
    for d in range(1, min(B, cap) + 1):
        if B % d == 0:
            tile = d
    return tile


def spatial_attention_forward(x_nchw, k_stacked, *, batch_tile=None):
    """x_nchw: (B, C, H, W) float32.  k_stacked: (2*H*W, H*W) folded conv operand
    from fold_conv_weights().  Returns (B, C, H, W) float32."""
    B, C, H, W = x_nchw.shape
    HW = H * W
    assert k_stacked.shape == (2 * HW, HW), k_stacked.shape

    # Layout glue: reshape only (no HBM transpose pass), keep elementwise math f32.
    x_flat = x_nchw.reshape(B, C, HW).astype(jnp.float32)

    if batch_tile is None:
        batch_tile = _choose_batch_tile(B, C, HW)
    grid = (B // batch_tile,)

    out = pl.pallas_call(
        spatial_attention_kernel,
        out_shape=jax.ShapeDtypeStruct((B, C, HW), jnp.float32),
        grid_spec=pltpu.PrefetchScalarGridSpec(
            num_scalar_prefetch=0,
            grid=grid,
            in_specs=[
                pl.BlockSpec((batch_tile, C, HW), lambda b: (b, 0, 0)),
                # Constant block, never re-fetched: single-buffer it.
                pl.BlockSpec((2 * HW, HW), lambda b: (0, 0),
                             pipeline_mode=pl.Buffered(1)),
            ],
            out_specs=pl.BlockSpec((batch_tile, C, HW), lambda b: (b, 0, 0)),
        ),
        # NOTE: could add input_output_aliases={0: 0} for inference if the caller
        # no longer needs x; we keep x intact here for the correctness check.
        compiler_params=pltpu.CompilerParams(
            dimension_semantics=("parallel",)),
    )(x_flat, k_stacked)

    return out.reshape(B, C, H, W)


# ---------------------------------------------------------------------------
# Pure-JAX reference
# ---------------------------------------------------------------------------
def reference_forward(x, conv_weight):
    avg = jnp.mean(x, axis=1, keepdims=True)
    mx = jnp.max(x, axis=1, keepdims=True)
    cat = jnp.concatenate([avg, mx], axis=1)                    # (B, 2, H, W)
    conv = lax.conv_general_dilated(
        cat, conv_weight, window_strides=(1, 1), padding="SAME",
        dimension_numbers=("NCHW", "OIHW", "NCHW"))
    att = jax.nn.sigmoid(conv)
    return x * att


if __name__ == "__main__":
    # Small shapes consistent with SpatialAttention(kernel_size=7).
    B, C, H, W = 2, 64, 16, 16
    key = jax.random.PRNGKey(0)
    kx, kw = jax.random.split(key, 2)

    x = jax.random.normal(kx, (B, C, H, W), dtype=jnp.float32)
    # Conv2d(2, 1, 7, padding=3, bias=False) weight, PyTorch OIHW layout.
    conv_w = 0.1 * jax.random.normal(kw, (1, 2, 7, 7), dtype=jnp.float32)

    # Fold the static conv weights exactly once (hoisted out of the forward path).
    k_stacked = fold_conv_weights(conv_w, H, W, C, dtype=jnp.bfloat16)

    out = spatial_attention_forward(x, k_stacked)
    jax.block_until_ready(out)

    ref = reference_forward(x, conv_w)
    assert out.shape == (B, C, H, W), out.shape
    err = float(jnp.max(jnp.abs(out - ref)))
    # Tolerance reflects the bf16 conv-as-matmul operand (f32 accumulation).
    assert jnp.allclose(out, ref, atol=5e-2, rtol=5e-2), err

    print("KERNEL_OK")
</pallas_src>

<mosaic_0001>
module attributes {stable_mosaic.version = 11 : i64} {
  func.func @spatial_attention_kernel(%arg0: i32, %arg1: memref<2x64x256xf32, #tpu.memory_space<vmem>>, %arg2: memref<512x256xbf16, #tpu.memory_space<vmem>>, %arg3: memref<2x64x256xf32, #tpu.memory_space<vmem>>) attributes {dimension_semantics = [#tpu.dimension_semantics<parallel>], iteration_bounds = array<i64: 1>, scalar_prefetch = 0 : i64, scratch_operands = 0 : i64, tpu.core_type = #tpu.core_type<tc>, window_params = [{transform_indices = @transform_0, window_bounds = array<i64: 2, 64, 256>}, {pipeline_mode = #tpu.pipeline_mode<synchronous>, transform_indices = @transform_1, window_bounds = array<i64: 512, 256>}, {transform_indices = @transform_2, window_bounds = array<i64: 2, 64, 256>}]} {
    %c0 = arith.constant 0 : index
    %c0_0 = arith.constant 0 : index
    %c0_1 = arith.constant 0 : index
    %0 = vector.load %arg1[%c0, %c0_0, %c0_1] : memref<2x64x256xf32, #tpu.memory_space<vmem>>, vector<2x64x256xf32>
    %cst = arith.constant dense<0.000000e+00> : vector<2x256xf32>
    %1 = vector.multi_reduction <add>, %0, %cst [1] : vector<2x64x256xf32> to vector<2x256xf32>
    %cst_2 = arith.constant dense<0xFF800000> : vector<2x256xf32>
    %2 = vector.multi_reduction <maximumf>, %0, %cst_2 [1] : vector<2x64x256xf32> to vector<2x256xf32>
    %3 = tpu.concatenate %1, %2 in 1 : vector<2x256xf32>, vector<2x256xf32> -> vector<2x512xf32>
    %4 = arith.truncf %3 : vector<2x512xf32> to vector<2x512xbf16>
    %c0_3 = arith.constant 0 : index
    %c0_4 = arith.constant 0 : index
    %5 = vector.load %arg2[%c0_3, %c0_4] : memref<512x256xbf16, #tpu.memory_space<vmem>>, vector<512x256xbf16>
    %cst_5 = arith.constant dense<0.000000e+00> : vector<2x256xf32>
    %6 = tpu.matmul %4, %5, %cst_5 {dimension_numbers = #tpu.dot_dimension_numbers<[1], [0], [0], [1], [0, 0, 1, 1], [], []>} : vector<2x512xbf16>, vector<512x256xbf16>, vector<2x256xf32> -> vector<2x256xf32>
    %7 = arith.negf %6 : vector<2x256xf32>
    %8 = math.exp %7 : vector<2x256xf32>
    %cst_6 = arith.constant 1.000000e+00 : f32
    %9 = vector.broadcast %cst_6 : f32 to vector<2x256xf32>
    %10 = arith.addf %9, %8 : vector<2x256xf32>
    %11 = arith.divf %9, %10 : vector<2x256xf32>
    %12 = vector.shape_cast %11 : vector<2x256xf32> to vector<2x1x256xf32>
    %13 = vector.broadcast %12 : vector<2x1x256xf32> to vector<2x64x256xf32>
    %14 = arith.mulf %0, %13 : vector<2x64x256xf32>
    %c0_7 = arith.constant 0 : index
    %c0_8 = arith.constant 0 : index
    %c0_9 = arith.constant 0 : index
    %15 = vector.load %arg3[%c0_7, %c0_8, %c0_9] : memref<2x64x256xf32, #tpu.memory_space<vmem>>, vector<2x64x256xf32>
    tpu.vector_store %arg3[%c0_7, %c0_8, %c0_9], %14 {strides = array<i32>} : memref<2x64x256xf32, #tpu.memory_space<vmem>>, vector<2x64x256xf32>,
    return
  }
  func.func @transform_0(%arg0: i32) -> (i32, i32, i32) {
    %c0_i32 = arith.constant 0 : i32
    %c0_i32_0 = arith.constant 0 : i32
    %c0_i32_1 = arith.constant 0 : i32
    return %arg0, %c0_i32, %c0_i32_0 : i32, i32, i32
  }
  func.func @transform_1(%arg0: i32) -> (i32, i32) {
    %c0_i32 = arith.constant 0 : i32
    %c0_i32_0 = arith.constant 0 : i32
    %c0_i32_1 = arith.constant 0 : i32
    return %c0_i32, %c0_i32_0 : i32, i32
  }
  func.func @transform_2(%arg0: i32) -> (i32, i32, i32) {
    %c0_i32 = arith.constant 0 : i32
    %c0_i32_0 = arith.constant 0 : i32
    %c0_i32_1 = arith.constant 0 : i32
    return %arg0, %c0_i32, %c0_i32_0 : i32, i32, i32
  }
}

</mosaic_0001>

<bundles_post_ra>
// kernel: tpu_custom_call.1
= control target key start
LH: loop header
LB: loop body
LE: loop exit
PB: predicated region body
PF: predicated region fallthrough
CT: control target
= control target key end

     0   :  { %7 = vsyncpa [#allocation3], 0  ;;  %s1283_s0 = inlined_call_operand.hbm [shape: f32[2,64,256], index: 0, kind: input, shape index: {}]   ;;  %s1284_s1 = inlined_call_operand.hbm [shape: bf16[512,256], index: 1, kind: input, shape index: {}]   ;;  %s1285_s2 = inlined_call_operand.hbm [shape: f32[2,64,256], index: 2, kind: output, shape index: {}]  }
   0x1   :  { %8 = vsyncpa [#allocation6], 0 }
   0x2   :  { %9 = vsyncpa [#allocation4], 0  ;;  %s1054_s9 = smov [#allocation2]   ;;  %s982_s13 = scalar_lea.hbm %s1283_s0, 4096 }
   0x3   :  { %s15_s10 = sshll.u32 %s1054_s9, 4  ;;  %p983_p0 = scmp.ne.s32.totalorder %s1283_s0, %s982_s13  ;;  %s16_s10 = int_to_ptr.vmem [resolvable:$true] %s15_s10 }
   0x4   :  { %p986_p1 = scmp.lt.u32.totalorder %s982_s13, %s1283_s0 }
   0x6   :  { %p988_p2 = pnand %p986_p1, %p983_p0 }
   0x8   :  { %991 = shalt.err (!%p988_p2)
}
   0x9   :  { %s992_s18 = scalar_lea.vmem %s16_s10, 4096  ;;  %p997_p4 = scmp.lt.s32.totalorder %s16_s10, %s16_s10 }
   0xa   :  { %p993_p3 = scmp.ne.s32.totalorder %s16_s10, %s992_s18  ;;  %p998_p5 = scmp.lt.s32.totalorder %s992_s18, %s992_s18 }
   0xc   :  { %p999_p6 = por %p998_p5, %p997_p4 }
   0xe   :  { %p1000_p7 = pnand %p999_p6, %p993_p3 }
  0x10   :  { %1003 = shalt.err (!%p1000_p7)
}
  0x11   :  { %s1055_s19 = smov 256   ;;  %s1056_s20 = smov 16  }
  0x12   :  { %21 = dma.hbm_to_vmem [thread:$0]  %s1283_s0, 4096, %s16_s10, [#allocation3], %s1055_s19, %s1055_s19, %s1056_s20  }
  0x13   :  { %s1057_s23 = smov [#allocation5]   ;;  %s1004_s27 = scalar_lea.hbm %s1284_s1, 8192 }
  0x14   :  { %s27_s24 = sshll.u32 %s1057_s23, 4  ;;  %p1005_p8 = scmp.ne.s32.totalorder %s1284_s1, %s1004_s27  ;;  %s28_s24 = int_to_ptr.vmem [resolvable:$true] %s27_s24 }
  0x15   :  { %p1008_p9 = scmp.lt.u32.totalorder %s1004_s27, %s1284_s1 }
  0x17   :  { %p1010_p10 = pnand %p1008_p9, %p1005_p8 }
  0x19   :  { %1013 = shalt.err (!%p1010_p10)
}
  0x1a   :  { %s1014_s4 = scalar_lea.vmem %s28_s24, 8192  ;;  %p1019_p12 = scmp.lt.s32.totalorder %s28_s24, %s28_s24 }
  0x1b   :  { %p1015_p11 = scmp.ne.s32.totalorder %s28_s24, %s1014_s4  ;;  %p1020_p13 = scmp.lt.s32.totalorder %s1014_s4, %s1014_s4 }
  0x1d   :  { %p1021_p0 = por %p1020_p13, %p1019_p12 }
  0x1f   :  { %p1022_p1 = pnand %p1021_p0, %p1015_p11 }
  0x21   :  { %1025 = shalt.err (!%p1022_p1)
}
  0x22   :  { %s1058_s0 = smov 128   ;;  %s1059_s5 = smov 8  }
  0x23   :  { %33 = dma.hbm_to_vmem [thread:$0]  %s1284_s1, 8192, %s28_s24, [#allocation6], %s1058_s0, %s1058_s0, %s1059_s5  }
  0x24   :  { %1048 = dma.done.wait [#allocation3], 4096  }
  0x25   :  { %1049 = vsyncadd [#allocation3], 4294963200 }
  0x26   :  { %1050 = dma.done.wait [#allocation6], 8192  }
  0x27   :  { %1051 = vsyncadd [#allocation6], 4294959104  ;;  %v878_v0 = vld [vmem:[#allocation5 + $0x4] ss:$8 sps:$4 sm:$0xff]   ;;  %v882_v2 = vld [vmem:[#allocation5] ss:$8 sps:$4 sm:$0xff]  }
  0x28   :  { %v880_v1 = vld [vmem:[#allocation5 + $0x104] ss:$8 sps:$4 sm:$0xff]   ;;  %581 = vmatprep.subr.bf16.mxu1 %v878_v0  ;;  %v883_v3 = vld [vmem:[#allocation5 + $0x100] ss:$8 sps:$4 sm:$0xff]   ;;  %v884_v4 = vld [vmem:[#allocation5 + $0x14] ss:$8 sps:$4 sm:$0xff]  }
  0x29   :  { %622 = vmatprep.subr.bf16.mxu0 %v880_v1  ;;  %582 = vmatpush1.bf16.msra.mxu1 %v882_v2  ;;  %v886_v5 = vld [vmem:[#allocation5 + $0x114] ss:$8 sps:$4 sm:$0xff]   ;;  %v888_v6 = vld [vmem:[#allocation5 + $0x10] ss:$8 sps:$4 sm:$0xff]   ;;  %v890_v8 = vld [vmem:[#allocation5 + $0x24] ss:$8 sps:$4 sm:$0xff]  }
  0x2a   :  { %623 = vmatpush1.bf16.msra.mxu0 %v883_v3  ;;  %583 = vmatprep.subr.bf16.mxu1 %v884_v4  ;;  %v889_v7 = vld [vmem:[#allocation5 + $0x110] ss:$8 sps:$4 sm:$0xff]   ;;  %v892_v9 = vld [vmem:[#allocation5 + $0x124] ss:$8 sps:$4 sm:$0xff]   ;;  %v894_v10 = vld [vmem:[#allocation5 + $0x20] ss:$8 sps:$4 sm:$0xff]  }
  0x2b   :  { %624 = vmatprep.subr.bf16.mxu0 %v886_v5  ;;  %v895_v11 = vld [vmem:[#allocation5 + $0x120] ss:$8 sps:$4 sm:$0xff]   ;;  %v896_v12 = vld [vmem:[#allocation5 + $0x34] ss:$8 sps:$4 sm:$0xff]   ;;  %v900_v14 = vld [vmem:[#allocation5 + $0x30] ss:$8 sps:$4 sm:$0xff]  }
  0x2c   :  { %v898_v13 = vld [vmem:[#allocation5 + $0x134] ss:$8 sps:$4 sm:$0xff]   ;;  %v901_v15 = vld [vmem:[#allocation5 + $0x130] ss:$8 sps:$4 sm:$0xff]   ;;  %v902_v16 = vld [vmem:[#allocation5 + $0x44] ss:$8 sps:$4 sm:$0xff]  }
  0x2d   :  { %584 = vmatpush1.bf16.msra.mxu1 %v888_v6  ;;  %v904_v17 = vld [vmem:[#allocation5 + $0x144] ss:$8 sps:$4 sm:$0xff]   ;;  %v906_v18 = vld [vmem:[#allocation5 + $0x40] ss:$8 sps:$4 sm:$0xff]   ;;  %v908_v20 = vld [vmem:[#allocation5 + $0x54] ss:$8 sps:$4 sm:$0xff]  }
  0x2e   :  { %625 = vmatpush1.bf16.msra.mxu0 %v889_v7  ;;  %585 = vmatprep.subr.bf16.mxu1 %v890_v8  ;;  %v907_v19 = vld [vmem:[#allocation5 + $0x140] ss:$8 sps:$4 sm:$0xff]   ;;  %v910_v21 = vld [vmem:[#allocation5 + $0x154] ss:$8 sps:$4 sm:$0xff]   ;;  %v912_v22 = vld [vmem:[#allocation5 + $0x50] ss:$8 sps:$4 sm:$0xff]  }
  0x2f   :  { %626 = vmatprep.subr.bf16.mxu0 %v892_v9  ;;  %v913_v23 = vld [vmem:[#allocation5 + $0x150] ss:$8 sps:$4 sm:$0xff]   ;;  %v914_v24 = vld [vmem:[#allocation5 + $0x64] ss:$8 sps:$4 sm:$0xff]   ;;  %v918_v26 = vld [vmem:[#allocation5 + $0x60] ss:$8 sps:$4 sm:$0xff]  }
  0x30   :  { %v916_v25 = vld [vmem:[#allocation5 + $0x164] ss:$8 sps:$4 sm:$0xff]   ;;  %v919_v27 = vld [vmem:[#allocation5 + $0x160] ss:$8 sps:$4 sm:$0xff]   ;;  %v920_v28 = vld [vmem:[#allocation5 + $0x74] ss:$8 sps:$4 sm:$0xff]  }
  0x31   :  { %586 = vmatpush1.bf16.msra.mxu1 %v894_v10  ;;  %v922_v29 = vld [vmem:[#allocation5 + $0x174] ss:$8 sps:$4 sm:$0xff]   ;;  %v924_v30 = vld [vmem:[#allocation5 + $0x70] ss:$8 sps:$4 sm:$0xff]   ;;  %v926_v32 = vld [vmem:[#allocation5 + $0x84] ss:$8 sps:$4 sm:$0xff]  }
  0x32   :  { %627 = vmatpush1.bf16.msra.mxu0 %v895_v11  ;;  %587 = vmatprep.subr.bf16.mxu1 %v896_v12  ;;  %v925_v31 = vld [vmem:[#allocation5 + $0x170] ss:$8 sps:$4 sm:$0xff]   ;;  %v928_v33 = vld [vmem:[#allocation5 + $0x184] ss:$8 sps:$4 sm:$0xff]   ;;  %v930_v34 = vld [vmem:[#allocation5 + $0x80] ss:$8 sps:$4 sm:$0xff]  }
  0x33   :  { %628 = vmatprep.subr.bf16.mxu0 %v898_v13  ;;  %v931_v35 = vld [vmem:[#allocation5 + $0x180] ss:$8 sps:$4 sm:$0xff]   ;;  %v932_v36 = vld [vmem:[#allocation5 + $0x94] ss:$8 sps:$4 sm:$0xff]   ;;  %v936_v38 = vld [vmem:[#allocation5 + $0x90] ss:$8 sps:$4 sm:$0xff]  }
  0x34   :  { %v934_v37 = vld [vmem:[#allocation5 + $0x194] ss:$8 sps:$4 sm:$0xff]   ;;  %v937_v39 = vld [vmem:[#allocation5 + $0x190] ss:$8 sps:$4 sm:$0xff]   ;;  %v938_v40 = vld [vmem:[#allocation5 + $0xa4] ss:$8 sps:$4 sm:$0xff]  }
  0x35   :  { %588 = vmatpush1.bf16.msra.mxu1 %v900_v14  ;;  %v940_v41 = vld [vmem:[#allocation5 + $0x1a4] ss:$8 sps:$4 sm:$0xff]   ;;  %v942_v42 = vld [vmem:[#allocation5 + $0xa0] ss:$8 sps:$4 sm:$0xff]   ;;  %v944_v44 = vld [vmem:[#allocation5 + $0xb4] ss:$8 sps:$4 sm:$0xff]  }
  0x36   :  { %629 = vmatpush1.bf16.msra.mxu0 %v901_v15  ;;  %589 = vmatprep.subr.bf16.mxu1 %v902_v16  ;;  %v943_v43 = vld [vmem:[#allocation5 + $0x1a0] ss:$8 sps:$4 sm:$0xff]   ;;  %v946_v45 = vld [vmem:[#allocation5 + $0x1b4] ss:$8 sps:$4 sm:$0xff]   ;;  %v948_v47 = vld [vmem:[#allocation5 + $0xb0] ss:$8 sps:$4 sm:$0xff]  }
  0x37   :  { %630 = vmatprep.subr.bf16.mxu0 %v904_v17  ;;  %v1104_v46 = vld [vmem:[#allocation2 + $0x8] sm:$0xff]  ;;  %v1106_v48 = vld [vmem:[#allocation2 + $0x18] sm:$0xff]  ;;  %v1135_v7 = vld [vmem:[#allocation2] sm:$0xff]  ;;  %vm180_vm0 = vcmask 1041409   ;;  %s1061_s1 = smov [#allocation7]  }
  0x38   :  { %v1108_v49 = vld [vmem:[#allocation2 + $0x28] sm:$0xff]  ;;  %v949_v50 = vld [vmem:[#allocation5 + $0x1b0] ss:$8 sps:$4 sm:$0xff]   ;;  %v85_v53 = vadd.f32 %v1106_v48, %v1104_v46  ;;  %v137_v54 = vmax.f32 %v1104_v46, %v1106_v48  ;;  %v956_v1 = vld [vmem:[#allocation5 + $0xd4] ss:$8 sps:$4 sm:$0xff]   ;;  %s789_s8 = sshll.u32 %s1061_s1, 4  ;;  %s790_s8 = int_to_ptr.vmem [resolvable:$true] %s789_s8 }
  0x39   :  { %590 = vmatpush1.bf16.msra.mxu1 %v906_v18  ;;  %v950_v51 = vld [vmem:[#allocation5 + $0xc4] ss:$8 sps:$4 sm:$0xff]   ;;  %v1114_v55 = vld [vmem:[#allocation2 + $0x38] sm:$0xff]  ;;  %v954_v58 = vld [vmem:[#allocation5 + $0xc0] ss:$8 sps:$4 sm:$0xff]   ;;  %s1026_s9 = scalar_lea.vmem %s790_s8, 4096  ;;  %p1031_p3 = scmp.lt.s32.totalorder %s790_s8, %s790_s8 }
  0x3a   :  { %631 = vmatpush1.bf16.msra.mxu0 %v907_v19  ;;  %591 = vmatprep.subr.bf16.mxu1 %v908_v20  ;;  %v952_v52 = vld [vmem:[#allocation5 + $0x1c4] ss:$8 sps:$4 sm:$0xff]   ;;  %v1118_v57 = vld [vmem:[#allocation2 + $0x98] sm:$0xff]  ;;  %v955_v59 = vld [vmem:[#allocation5 + $0x1c0] ss:$8 sps:$4 sm:$0xff]   ;;  %v86_v61 = vadd.f32 %v85_v53, %v1108_v49  ;;  %v138_v63 = vmax.f32 %v137_v54, %v1108_v49  ;;  %p1027_p2 = scmp.ne.s32.totalorder %s790_s8, %s1026_s9  ;;  %p1032_p4 = scmp.lt.s32.totalorder %s1026_s9, %s1026_s9 }
  0x3b   :  { %632 = vmatprep.subr.bf16.mxu0 %v910_v21  ;;  %v1116_v56 = vld [vmem:[#allocation2 + $0x88] sm:$0xff]  ;;  %v1130_v3 = vld [vmem:[#allocation2 + $0xb8] sm:$0xff]  ;;  %v1137_v8 = vld [vmem:[#allocation2 + $0x10] sm:$0xff] }
  0x3c   :  { %v1120_v60 = vld [vmem:[#allocation2 + $0xa8] sm:$0xff]  ;;  %v111_v62 = vadd.f32 %v1118_v57, %v1116_v56  ;;  %v163_v0 = vmax.f32 %v1116_v56, %v1118_v57  ;;  %v87_v4 = vadd.f32 %v86_v61, %v1114_v55  ;;  %v139_v6 = vmax.f32 %v138_v63, %v1114_v55  ;;  %v1139_v9 = vld [vmem:[#allocation2 + $0x20] sm:$0xff]  ;;  %v958_v10 = vld [vmem:[#allocation5 + $0x1d4] ss:$8 sps:$4 sm:$0xff]   ;;  %p1033_p5 = por %p1032_p4, %p1031_p3 }
  0x3d   :  { %592 = vmatpush1.bf16.msra.mxu1 %v912_v22  ;;  %v1128_v2 = vld [vmem:[#allocation2 + $0x48] sm:$0xff]  ;;  %v1141_v11 = vld [vmem:[#allocation2 + $0x58] sm:$0xff]  ;;  %v72_v14 = vadd.f32 %v1137_v8, %v1135_v7  ;;  %v124_v15 = vmax.f32 %v1135_v7, %v1137_v8  ;;  %v1153_v21 = vld [vmem:[#allocation2 + $0x30] sm:$0xff] }
  0x3e   :  { %633 = vmatpush1.bf16.msra.mxu0 %v913_v23  ;;  %593 = vmatprep.subr.bf16.mxu1 %v914_v24  ;;  %v112_v5 = vadd.f32 %v111_v62, %v1120_v60  ;;  %v1143_v12 = vld [vmem:[#allocation2 + $0xc8] sm:$0xff]  ;;  %v164_v13 = vmax.f32 %v163_v0, %v1120_v60  ;;  %v960_v16 = vld [vmem:[#allocation5 + $0xd0] ss:$8 sps:$4 sm:$0xff]   ;;  %v88_v18 = vadd.f32 %v87_v4, %v1128_v2  ;;  %v1155_v22 = vld [vmem:[#allocation2 + $0x80] sm:$0xff]  ;;  %p1034_p6 = pnand %p1033_p5, %p1027_p2 }
  0x3f   :  { %634 = vmatprep.subr.bf16.mxu0 %v916_v25  ;;  %v961_v17 = vld [vmem:[#allocation5 + $0x1d0] ss:$8 sps:$4 sm:$0xff]   ;;  %v140_v20 = vmax.f32 %v139_v6, %v1128_v2  ;;  %v1157_v23 = vld [vmem:[#allocation2 + $0x68] sm:$0xff]  ;;  %v1199_v0 = vld [vmem:[#allocation2 + $0x60] sm:$0xff] }
  0x40   :  { %v113_v19 = vadd.f32 %v112_v5, %v1130_v3  ;;  %v1159_v24 = vld [vmem:[#allocation2 + $0xd8] sm:$0xff]  ;;  %v165_v25 = vmax.f32 %v164_v13, %v1130_v3 }
  0x41   :  { %594 = vmatpush1.bf16.msra.mxu1 %v918_v26  ;;  %v1162_v26 = vld [vmem:[#allocation2 + $0x90] sm:$0xff] }
  0x42   :  { %635 = vmatpush1.bf16.msra.mxu0 %v919_v27  ;;  %595 = vmatprep.subr.bf16.mxu1 %v920_v28  ;;  %v73_v27 = vadd.f32 %v72_v14, %v1139_v9  ;;  %v125_v28 = vmax.f32 %v124_v15, %v1139_v9  ;;  %v968_v4 = vld [vmem:[#allocation5 + $0xf4] ss:$8 sps:$4 sm:$0xff]  }
  0x43   :  { %636 = vmatprep.subr.bf16.mxu0 %v922_v29  ;;  %v962_v29 = vld [vmem:[#allocation5 + $0xe4] ss:$8 sps:$4 sm:$0xff]   ;;  %v970_v5 = vld [vmem:[#allocation5 + $0x1f4] ss:$8 sps:$4 sm:$0xff]  }
  0x45   :  { %596 = vmatpush1.bf16.msra.mxu1 %v924_v30  ;;  %v89_v30 = vadd.f32 %v88_v18, %v1141_v11  ;;  %v1209_v18 = vld [vmem:[#allocation2 + $0xd0] sm:$0xff] }
  0x46   :  { %637 = vmatpush1.bf16.msra.mxu0 %v925_v31  ;;  %597 = vmatprep.subr.bf16.mxu1 %v926_v32  ;;  %v114_v31 = vadd.f32 %v113_v19, %v1143_v12  ;;  %v141_v32 = vmax.f32 %v140_v20, %v1141_v11 }
  0x47   :  { %638 = vmatprep.subr.bf16.mxu0 %v928_v33  ;;  %v1169_v33 = vld [vmem:[#allocation2 + $0x40] sm:$0xff] }
  0x49   :  { %598 = vmatpush1.bf16.msra.mxu1 %v930_v34  ;;  %v1171_v34 = vld [vmem:[#allocation2 + $0xa0] sm:$0xff] }
  0x4a   :  { %639 = vmatpush1.bf16.msra.mxu0 %v931_v35  ;;  %599 = vmatprep.subr.bf16.mxu1 %v932_v36  ;;  %v964_v35 = vld [vmem:[#allocation5 + $0x1e4] ss:$8 sps:$4 sm:$0xff]   ;;  %v1173_v36 = vld [vmem:[#allocation2 + $0x78] sm:$0xff] }
  0x4b   :  { %640 = vmatprep.subr.bf16.mxu0 %v934_v37  ;;  %v1175_v37 = vld [vmem:[#allocation2 + $0xe8] sm:$0xff] }
  0x4d   :  { %600 = vmatpush1.bf16.msra.mxu1 %v936_v38  ;;  %v166_v38 = vmax.f32 %v165_v25, %v1143_v12 }
  0x4e   :  { %641 = vmatpush1.bf16.msra.mxu0 %v937_v39  ;;  %601 = vmatprep.subr.bf16.mxu1 %v938_v40  ;;  %v74_v39 = vadd.f32 %v73_v27, %v1153_v21  ;;  %v98_v40 = vadd.f32 %v1162_v26, %v1155_v22 }
  0x4f   :  { %642 = vmatprep.subr.bf16.mxu0 %v940_v41  ;;  %v90_v41 = vadd.f32 %v89_v30, %v1157_v23  ;;  %v973_v30 = vld [vmem:[#allocation5 + $0x1f0] ss:$8 sps:$4 sm:$0xff]  }
  0x50   :  { %v75_v53 = vadd.f32 %v74_v39, %v1169_v33  ;;  %v99_v54 = vadd.f32 %v98_v40, %v1171_v34 }
  0x51   :  { %602 = vmatpush1.bf16.msra.mxu1 %v942_v42  ;;  %v115_v42 = vadd.f32 %v114_v31, %v1159_v24  ;;  %v91_v61 = vadd.f32 %v90_v41, %v1173_v36 }
  0x52   :  { %643 = vmatpush1.bf16.msra.mxu0 %v943_v43  ;;  %603 = vmatprep.subr.bf16.mxu1 %v944_v44  ;;  %v142_v43 = vmax.f32 %v141_v32, %v1157_v23  ;;  %v1184_v44 = vld [vmem:[#allocation2 + $0x50] sm:$0xff] }
  0x53   :  { %644 = vmatprep.subr.bf16.mxu0 %v946_v45  ;;  %v1186_v45 = vld [vmem:[#allocation2 + $0xb0] sm:$0xff]  ;;  %v116_v62 = vadd.f32 %v115_v42, %v1175_v37  ;;  %v92_v14 = vrot.slane %v91_v61, 4 }
  0x54   :  { %v143_v63 = vmax.f32 %v142_v43, %v1173_v36  ;;  %v100_v13 = vadd.f32 %v99_v54, %v1186_v45 }
  0x55   :  { %604 = vmatpush1.bf16.msra.mxu1 %v948_v47  ;;  %v126_v47 = vmax.f32 %v125_v28, %v1153_v21  ;;  %v93_v31 = vadd.f32 %v92_v14, %v91_v61 }
  0x56   :  { %645 = vmatpush1.bf16.msra.mxu0 %v949_v50  ;;  %605 = vmatprep.subr.bf16.mxu1 %v950_v51  ;;  %v966_v50 = vld [vmem:[#allocation5 + $0xe0] ss:$8 sps:$4 sm:$0xff]   ;;  %v1189_v51 = vld [vmem:[#allocation2 + $0xf8] sm:$0xff] }
  0x57   :  { %646 = vmatprep.subr.bf16.mxu0 %v952_v52  ;;  %v167_v52 = vmax.f32 %v166_v38, %v1159_v24  ;;  %v117_v15 = vadd.f32 %v116_v62, %v1189_v51  ;;  %v127_v19 = vmax.f32 %v126_v47, %v1169_v33  ;;  %v1216_v38 = vld [vmem:[#allocation2 + $0xe0] sm:$0xff]  ;;  %v94_v47 = vrot.slane %v93_v31, 2 }
  0x59   :  { %606 = vmatpush1.bf16.msra.mxu1 %v954_v58  ;;  %v150_v58 = vmax.f32 %v1155_v22, %v1162_v26  ;;  %v168_v6 = vmax.f32 %v167_v52, %v1175_v37  ;;  %v118_v32 = vrot.slane %v117_v15, 4  ;;  %v128_v39 = vmax.f32 %v127_v19, %v1184_v44 }
  0x5a   :  { %647 = vmatpush1.bf16.msra.mxu0 %v955_v59  ;;  %607 = vmatprep.subr.bf16.mxu1 %v956_v1  ;;  %v967_v59 = vld [vmem:[#allocation5 + $0x1e0] ss:$8 sps:$4 sm:$0xff]  }
  0x5b   :  { %648 = vmatprep.subr.bf16.mxu0 %v958_v10  ;;  %v1201_v1 = vld [vmem:[#allocation2 + $0xc0] sm:$0xff]  ;;  %v76_v10 = vadd.f32 %v75_v53, %v1184_v44  ;;  %v169_v20 = vmax.f32 %v168_v6, %v1189_v51  ;;  %v151_v28 = vmax.f32 %v150_v58, %v1171_v34  ;;  %v1222_v53 = vld [vmem:[#allocation2 + $0xf0] sm:$0xff]  ;;  %v129_v54 = vmax.f32 %v128_v39, %v1199_v0 }
  0x5c   :  { %v101_v27 = vadd.f32 %v100_v13, %v1201_v1 }
  0x5d   :  { %608 = vmatpush1.bf16.msra.mxu1 %v960_v16  ;;  %v144_v16 = vrot.slane %v143_v63, 4  ;;  %v77_v25 = vadd.f32 %v76_v10, %v1199_v0  ;;  %v170_v40 = vrot.slane %v169_v20, 4  ;;  %v152_v43 = vmax.f32 %v151_v28, %v1186_v45 }
  0x5e   :  { %649 = vmatpush1.bf16.msra.mxu0 %v961_v17  ;;  %609 = vmatprep.subr.bf16.mxu1 %v962_v29  ;;  %v1207_v17 = vld [vmem:[#allocation2 + $0x70] sm:$0xff]  ;;  %v102_v42 = vadd.f32 %v101_v27, %v1209_v18 }
  0x5f   :  { %650 = vmatprep.subr.bf16.mxu0 %v964_v35  ;;  %v972_v29 = vld [vmem:[#allocation5 + $0xf0] ss:$8 sps:$4 sm:$0xff]   ;;  %v145_v35 = vmax.f32 %v143_v63, %v144_v16  ;;  %v78_v41 = vadd.f32 %v77_v25, %v1207_v17  ;;  %v171_v58 = vmax.f32 %v169_v20, %v170_v40  ;;  %v153_v62 = vmax.f32 %v152_v43, %v1201_v1 }
  0x60   :  { %v103_v61 = vadd.f32 %v102_v42, %v1216_v38  ;;  %v95_v63 = vadd.f32 %v94_v47, %v93_v31  ;;  %v130_v6 = vmax.f32 %v129_v54, %v1207_v17 }
  0x61   :  { %610 = vmatpush1.bf16.msra.mxu1 %v966_v50  ;;  %v119_v50 = vadd.f32 %v118_v32, %v117_v15  ;;  %v146_v52 = vrot.slane %v145_v35, 2  ;;  %v172_v10 = vrot.slane %v171_v58, 2  ;;  %v154_v15 = vmax.f32 %v153_v62, %v1209_v18 }
  0x62   :  { %651 = vmatpush1.bf16.msra.mxu0 %v967_v59  ;;  %611 = vmatprep.subr.bf16.mxu1 %v968_v4  ;;  %v79_v59 = vrot.slane %v78_v41, 4  ;;  %v104_v14 = vadd.f32 %v103_v61, %v1222_v53  ;;  %v96_v16 = vrot.slane %v95_v63, 1  ;;  %v131_v25 = vrot.slane %v130_v6, 4 }
  0x63   :  { %652 = vmatprep.subr.bf16.mxu0 %v970_v5  ;;  %v120_v4 = vrot.slane %v119_v50, 2  ;;  %v147_v5 = vmax.f32 %v145_v35, %v146_v52  ;;  %v173_v27 = vmax.f32 %v171_v58, %v172_v10 }
  0x64   :  { %v80_v13 = vadd.f32 %v79_v59, %v78_v41  ;;  %v105_v32 = vrot.slane %v104_v14, 4  ;;  %v132_v39 = vmax.f32 %v130_v6, %v131_v25 }
  0x65   :  { %612 = vmatpush1.bf16.msra.mxu1 %v972_v29  ;;  %v121_v19 = vadd.f32 %v120_v4, %v119_v50  ;;  %v148_v20 = vrot.slane %v147_v5, 1  ;;  %v155_v29 = vmax.f32 %v154_v15, %v1216_v38  ;;  %v174_v40 = vrot.slane %v173_v27, 1 }
  0x66   :  { %653 = vmatpush1.bf16.msra.mxu0 %v973_v30  ;;  %v81_v28 = vrot.slane %v80_v13, 2  ;;  %v97_v30 = vadd.f32 %v96_v16, %v95_v63  ;;  %v106_v41 = vadd.f32 %v105_v32, %v104_v14  ;;  %v133_v52 = vrot.slane %v132_v39, 2 }
  0x67   :  { %v122_v31 = vrot.slane %v121_v19, 1  ;;  %v149_v35 = vmax.f32 %v147_v5, %v148_v20  ;;  %v156_v43 = vmax.f32 %v155_v29, %v1222_v53  ;;  %v175_v54 = vmax.f32 %v173_v27, %v174_v40 }
  0x68   :  { %v82_v42 = vadd.f32 %v81_v28, %v80_v13  ;;  %v107_v59 = vrot.slane %v106_v41, 2  ;;  %v134_v62 = vmax.f32 %v132_v39, %v133_v52 }
  0x69   :  { %v123_v47 = vadd.f32 %v122_v31, %v121_v19  ;;  %v157_v61 = vrot.slane %v156_v43, 4  ;;  %v190_v63 = vsel %vm180_vm0, %v175_v54, %v149_v35 }
  0x6a   :  { %v83_v50 = vrot.slane %v82_v42, 1  ;;  %v108_v10 = vadd.f32 %v107_v59, %v106_v41  ;;  %v196_v5 = vpack.c.bf16 %v190_v63, %v190_v63  ;;  %v135_v15 = vrot.slane %v134_v62, 1 }
  0x6b   :  { %v182_v58 = vsel %vm180_vm0, %v123_v47, %v97_v30  ;;  %v158_v6 = vmax.f32 %v156_v43, %v157_v61 }
  0x6c   :  { %v194_v4 = vpack.c.bf16 %v182_v58, %v182_v58  ;;  %v84_v13 = vadd.f32 %v83_v50, %v82_v42  ;;  %v109_v14 = vrot.slane %v108_v10, 1  ;;  %654 = vmatprep.mubr.bf16.mxu0 %v196_v5  ;;  %v136_v28 = vmax.f32 %v134_v62, %v135_v15 }
  0x6d   :  { %v159_v16 = vrot.slane %v158_v6, 2 }
  0x6e   :  { %613 = vmatprep.mubr.bf16.mxu1 %v194_v4  ;;  %v110_v19 = vadd.f32 %v109_v14, %v108_v10  ;;  %v1060_v10 = vmov 1966171168  }
  0x6f   :  { %v160_v20 = vmax.f32 %v158_v6, %v159_v16  ;;  %v679_v5 = vunpack.c.l.s4 %v1060_v10  ;;  %v681_v6 = vlaneseq }
  0x70   :  { %v181_v25 = vsel %vm180_vm0, %v110_v19, %v84_v13 }
  0x71   :  { %v193_v27 = vpack.c.bf16 %v181_v25, %v181_v25  ;;  %v161_v32 = vrot.slane %v160_v20, 1  ;;  %v680_v13 = vunpack.c.0.s8 %v679_v5  ;;  %v682_v14 = vshrl.u32 %v681_v6, 7 }
  0x73   :  { %614 = vmatmul.mubr.bf16.vlgmr.msra.gmra.mrb[0].mxu1 %v193_v27  ;;  %v162_v29 = vmax.f32 %v160_v20, %v161_v32  ;;  %v683_v16 = vsub.s32 %v680_v13, %v682_v14  ;;  %v702_v27 = vsub.s32 0, %v682_v14 }
  0x75   :  { %v189_v30 = vsel %vm180_vm0, %v162_v29, %v136_v28  ;;  %v706_v28 = vsub.s32 1, %v682_v14 }
  0x76   :  { %v195_v31 = vpack.c.bf16 %v189_v30, %v189_v30 }
  0x78   :  { %655 = vmatmul.mubr.bf16.vlgmr.msra.gmra.mrb[0].mxu0 %v195_v31 }
 0x146   :  { %v615_v35 = vpop.f32.mrb[0].mxu1 }
 0x147   :  { %v617_v39 = vpop.f32.mrb[1].mxu1 }
 0x148   :  { %v619_v40 = vpop.f32.mrb[2].mxu1 }
 0x149   :  { %v620_v42 = vpop.f32.mrb[3].mxu1 }
 0x14b   :  { %v656_v41 = vpop.f32.mrb[0].mxu0 }
 0x14c   :  { %v657_v43 = vadd.f32 %v656_v41, %v615_v35  ;;  %v658_v47 = vpop.f32.mrb[1].mxu0 }
 0x14d   :  { %v659_v52 = vadd.f32 %v658_v47, %v617_v39  ;;  %v660_v54 = vpop.f32.mrb[2].mxu0 }
 0x14e   :  { %v866_v50 = vmul.f32 -1.442695, %v657_v43  ;;  %v661_v59 = vpop.f32.mrb[3].mxu0 }
 0x14f   :  { %v867_v61 = vmul.f32 -1.442695, %v659_v52 }
 0x150   :  { %974 = vpow2.f32 %v866_v50 }
 0x151   :  { %976 = vpow2.f32 %v867_v61 }
 0x15a   :  { %v975_v58 = vpop.eup %974 }
 0x15b   :  { %v977_v62 = vpop.eup %976  ;;  %v669_v4 = vadd.f32 1.0, %v975_v58 }
 0x15c   :  { %v670_v63 = vadd.f32 1.0, %v977_v62 }
 0x15d   :  { %978 = vrcp.f32 %v669_v4 }
 0x15e   :  { %980 = vrcp.f32 %v670_v63 }
 0x167   :  { %v979_v15 = vpop.eup %978 }
 0x168   :  { %v981_v19 = vpop.eup %980 }
 0x169   :  { %v677_v20 = vcombine.low %v979_v15, %v981_v19 }
 0x16b   :  { %v684_v25 = vrot.slane %v677_v20, %v683_v16 }
 0x16d   :  { %v685_v32 = vcombine.high %v684_v25, %v684_v25  ;;  %v692_v29 = vrot.slane %v684_v25, %v683_v16 }
 0x16f   :  { %v699_v30 = vrot.slane %v685_v32, %v683_v16  ;;  %v703_v31 = vrot.slane %v692_v29, %v702_v27  ;;  %v707_v35 = vrot.slane %v692_v29, %v706_v28 }
 0x171   :  { %v711_v39 = vrot.slane %v699_v30, %v702_v27  ;;  %v715_v40 = vrot.slane %v699_v30, %v706_v28  ;;  %v720_v42 = vmul.f32 %v703_v31, %v1135_v7  ;;  %v721_v41 = vmul.f32 %v707_v35, %v1104_v46 }
 0x172   :  { %v722_v43 = vmul.f32 %v703_v31, %v1137_v8  ;;  %v723_v47 = vmul.f32 %v707_v35, %v1106_v48  ;;  %v724_v52 = vmul.f32 %v703_v31, %v1139_v9  ;;  %v725_v54 = vmul.f32 %v707_v35, %v1108_v49 }
 0x173   :  { %v726_v50 = vmul.f32 %v703_v31, %v1153_v21  ;;  %v727_v59 = vmul.f32 %v707_v35, %v1114_v55  ;;  %v728_v61 = vmul.f32 %v703_v31, %v1169_v33  ;;  %v729_v58 = vmul.f32 %v707_v35, %v1128_v2  ;;  %752 = vst [vmem:[#allocation7] sm:$0xff] %v720_v42 }
 0x174   :  { %753 = vst [vmem:[#allocation7 + $0x8] sm:$0xff] %v721_v41  ;;  %v730_v46 = vmul.f32 %v703_v31, %v1184_v44  ;;  %v731_v7 = vmul.f32 %v707_v35, %v1141_v11  ;;  %v732_v48 = vmul.f32 %v703_v31, %v1199_v0  ;;  %v733_v8 = vmul.f32 %v707_v35, %v1157_v23 }
 0x175   :  { %754 = vst [vmem:[#allocation7 + $0x10] sm:$0xff] %v722_v43  ;;  %755 = vst [vmem:[#allocation7 + $0x18] sm:$0xff] %v723_v47  ;;  %v734_v49 = vmul.f32 %v703_v31, %v1207_v17  ;;  %v735_v55 = vmul.f32 %v707_v35, %v1173_v36  ;;  %v736_v2 = vmul.f32 %v711_v39, %v1155_v22 }
 0x176   :  { %756 = vst [vmem:[#allocation7 + $0x20] sm:$0xff] %v724_v52  ;;  %757 = vst [vmem:[#allocation7 + $0x28] sm:$0xff] %v725_v54  ;;  %v737_v9 = vmul.f32 %v715_v40, %v1116_v56  ;;  %v738_v11 = vmul.f32 %v711_v39, %v1162_v26  ;;  %v739_v21 = vmul.f32 %v715_v40, %v1118_v57 }
 0x177   :  { %758 = vst [vmem:[#allocation7 + $0x30] sm:$0xff] %v726_v50  ;;  %759 = vst [vmem:[#allocation7 + $0x38] sm:$0xff] %v727_v59  ;;  %v740_v23 = vmul.f32 %v711_v39, %v1171_v34  ;;  %v741_v33 = vmul.f32 %v715_v40, %v1120_v60  ;;  %v742_v56 = vmul.f32 %v711_v39, %v1186_v45 }
 0x178   :  { %760 = vst [vmem:[#allocation7 + $0x40] sm:$0xff] %v728_v61  ;;  %761 = vst [vmem:[#allocation7 + $0x48] sm:$0xff] %v729_v58  ;;  %v743_v22 = vmul.f32 %v715_v40, %v1130_v3  ;;  %v744_v36 = vmul.f32 %v711_v39, %v1201_v1  ;;  %v745_v26 = vmul.f32 %v715_v40, %v1143_v12 }
 0x179   :  { %762 = vst [vmem:[#allocation7 + $0x50] sm:$0xff] %v730_v46  ;;  %763 = vst [vmem:[#allocation7 + $0x58] sm:$0xff] %v731_v7  ;;  %v746_v57 = vmul.f32 %v711_v39, %v1209_v18  ;;  %v747_v60 = vmul.f32 %v715_v40, %v1159_v24  ;;  %v748_v34 = vmul.f32 %v711_v39, %v1216_v38 }
 0x17a   :  { %764 = vst [vmem:[#allocation7 + $0x60] sm:$0xff] %v732_v48  ;;  %765 = vst [vmem:[#allocation7 + $0x68] sm:$0xff] %v733_v8  ;;  %v749_v44 = vmul.f32 %v715_v40, %v1175_v37  ;;  %v750_v3 = vmul.f32 %v711_v39, %v1222_v53  ;;  %v751_v12 = vmul.f32 %v715_v40, %v1189_v51 }
 0x17b   :  { %766 = vst [vmem:[#allocation7 + $0x70] sm:$0xff] %v734_v49  ;;  %767 = vst [vmem:[#allocation7 + $0x78] sm:$0xff] %v735_v55 }
 0x17c   :  { %768 = vst [vmem:[#allocation7 + $0x80] sm:$0xff] %v736_v2  ;;  %769 = vst [vmem:[#allocation7 + $0x88] sm:$0xff] %v737_v9 }
 0x17d   :  { %770 = vst [vmem:[#allocation7 + $0x90] sm:$0xff] %v738_v11  ;;  %771 = vst [vmem:[#allocation7 + $0x98] sm:$0xff] %v739_v21 }
 0x17e   :  { %772 = vst [vmem:[#allocation7 + $0xa0] sm:$0xff] %v740_v23  ;;  %773 = vst [vmem:[#allocation7 + $0xa8] sm:$0xff] %v741_v33 }
 0x17f   :  { %774 = vst [vmem:[#allocation7 + $0xb0] sm:$0xff] %v742_v56  ;;  %775 = vst [vmem:[#allocation7 + $0xb8] sm:$0xff] %v743_v22 }
 0x180   :  { %776 = vst [vmem:[#allocation7 + $0xc0] sm:$0xff] %v744_v36  ;;  %777 = vst [vmem:[#allocation7 + $0xc8] sm:$0xff] %v745_v26 }
 0x181   :  { %778 = vst [vmem:[#allocation7 + $0xd0] sm:$0xff] %v746_v57  ;;  %779 = vst [vmem:[#allocation7 + $0xd8] sm:$0xff] %v747_v60 }
 0x182   :  { %780 = vst [vmem:[#allocation7 + $0xe0] sm:$0xff] %v748_v34  ;;  %781 = vst [vmem:[#allocation7 + $0xe8] sm:$0xff] %v749_v44 }
 0x183   :  { %782 = vst [vmem:[#allocation7 + $0xf0] sm:$0xff] %v750_v3  ;;  %783 = vst [vmem:[#allocation7 + $0xf8] sm:$0xff] %v751_v12 }
 0x184   :  { %1037 = shalt.err (!%p1034_p6)
}
 0x185   :  { %s1038_s12 = scalar_lea.hbm %s1285_s2, 4096 }
 0x186   :  { %p1039_p7 = scmp.ne.s32.totalorder %s1285_s2, %s1038_s12  ;;  %p1042_p8 = scmp.lt.u32.totalorder %s1038_s12, %s1285_s2 }
 0x188   :  { %p1044_p9 = pnand %p1042_p8, %p1039_p7 }
 0x18a   :  { %1047 = shalt.err (!%p1044_p9)
}
 0x18b   :  { %795 = dma.vmem_to_hbm [thread:$0]  %s790_s8, 4096, %s1285_s2, [#allocation4], %s1055_s19, %s1055_s19, %s1056_s20  }
 0x18c   :  { %1052 = dma.done.wait [#allocation4], 4096  }
 0x18d   :  { %1053 = vsyncadd [#allocation4], 4294963200 }
 0x18e   :  { %799 = vsyncpa [#allocation3], 1 }
 0x18f   :  { %800 = vsyncpa [#allocation6], 1 }
 0x190   :  { %801 = vsyncpa [#allocation4], 1 }

</bundles_post_ra>
